<compile_context>
chip_gen: v7x
topology: tpu7x:2x2x1
jax: 0.10.0
libtpu: 0.0.40
codegen_flags: <defaults>
</compile_context>

<pallas_src>
import functools

import jax
import jax.numpy as jnp
from jax.experimental import pallas as pl
from jax.experimental.pallas import tpu as pltpu


def _fused_mlp_kernel(x_ref, *refs, n_layers, matmul_dtype):
    """Fused per-voxel MLP on one (Cin, TS) spatial tile.

    x_ref : (Cin, TS)   channels on sublanes, spatial on lanes
    refs  : (w0, b0, w1, b1, ..., o_ref)
            w_l : (Cout_l, Cin_l) in matmul_dtype   b_l : (Cout_l, 1) f32
    o_ref : (Cout_last, TS)
    """
    o_ref = refs[-1]
    wb = refs[:-1]
    h = x_ref[...].astype(jnp.float32)
    for li in range(n_layers):
        w = wb[2 * li][...]                 # already matmul_dtype (bf16 default)
        b = wb[2 * li + 1][...]             # f32 (Cout, 1) lane-broadcast bias
        h = jnp.dot(w, h.astype(matmul_dtype),
                    preferred_element_type=jnp.float32) + b
        if li < n_layers - 1:               # hidden layers: ReLU; last is linear
            h = jnp.maximum(h, 0.0)
    o_ref[...] = h.astype(o_ref.dtype)


def _pick_spatial_tile(S, N, ts_max):
    """Pick the lane (spatial) tile. Returns (ts, needs_pad).

    Prefers tiles that are multiples of 128 AND divide S exactly (no pad/slice
    HBM copies). Among those, prefers a grid with >= 4 total steps (keeps both
    v7x TensorCores busy) unless that would force a tile < 1024 lanes.
    """
    cands = set()
    if S <= ts_max:
        cands.add(S)                        # full extent: no 128-divisibility req
    t = 128
    lim = min(S, ts_max)
    while t <= lim:
        if S % t == 0:
            cands.add(t)
        t += 128
    if not cands:
        # No clean tile: fall back to a 128-multiple tile + one pad/slice.
        return max(128, (ts_max // 128) * 128), True

    def n_steps(t):
        return N * ((S + t - 1) // t)

    good = [t for t in cands if n_steps(t) >= 4]
    if good and max(good) >= min(1024, max(cands)):
        return max(good), False
    return max(cands), False


def _fused_mlp(x3, params, ts_max=16384, matmul_dtype=jnp.bfloat16):
    """x3: (N, Cin, S) -> (N, Cout, S). All layers fused in one pallas_call."""
    N, Cin, S = x3.shape
    n_layers = len(params)
    Cout = params[-1][0].shape[0]

    ts, needs_pad = _pick_spatial_tile(S, N, ts_max)
    Sp = pl.cdiv(S, ts) * ts
    if needs_pad and Sp != S:
        x3 = jnp.pad(x3, ((0, 0), (0, 0), (0, Sp - S)))

    grid = (N, Sp // ts)

    flat_wb = []
    wb_specs = []
    for (w, b) in params:
        w_c = w.astype(matmul_dtype)        # cast weights ONCE in the wrapper
        b2 = b.astype(jnp.float32).reshape(-1, 1)   # (Cout, 1) lane-broadcast
        flat_wb += [w_c, b2]
        wb_specs += [
            pl.BlockSpec(w_c.shape, lambda n, s: (0, 0)),
            pl.BlockSpec(b2.shape, lambda n, s: (0, 0)),
        ]

    kernel = functools.partial(_fused_mlp_kernel, n_layers=n_layers,
                               matmul_dtype=matmul_dtype)
    out = pl.pallas_call(
        kernel,
        out_shape=jax.ShapeDtypeStruct((N, Cout, Sp), x3.dtype),
        grid_spec=pltpu.PrefetchScalarGridSpec(
            num_scalar_prefetch=0,
            grid=grid,
            in_specs=[pl.BlockSpec((None, Cin, ts), lambda n, s: (n, 0, s))]
                     + wb_specs,
            out_specs=pl.BlockSpec((None, Cout, ts), lambda n, s: (n, 0, s)),
        ),
        compiler_params=pltpu.CompilerParams(
            dimension_semantics=("parallel", "parallel"),
            vmem_limit_bytes=48 * 1024 * 1024),
    )(x3, *flat_wb)

    if Sp != S:
        out = out[:, :, :S]
    return out


def init_params(key, in_dim, hidden_list, out_dim):
    """Deterministic init matching the layer shapes of Linear_CNN.

    Conv3d(k=1) weight in PyTorch is (out, in, 1, 1, 1); we store the dense
    matrix as (out, in) plus a bias (out,), matching PyTorch's uniform bound.
    """
    dims = [in_dim] + list(hidden_list) + [out_dim]
    params = []
    for i in range(len(dims) - 1):
        cin, cout = dims[i], dims[i + 1]
        key, kw, kb = jax.random.split(key, 3)
        bound = 1.0 / jnp.sqrt(jnp.float32(cin))
        w = jax.random.uniform(kw, (cout, cin), jnp.float32, -bound, bound)
        b = jax.random.uniform(kb, (cout,), jnp.float32, -bound, bound)
        params.append((w, b))
    return params


def linear_cnn_forward(x_ncdhw, params, ts_max=16384,
                       matmul_dtype=jnp.bfloat16):
    """x_ncdhw: (N, C, D, H, W) float32 -> (N, out_dim, D, H, W)."""
    N, C, D, H, W = x_ncdhw.shape
    # NCDHW -> (N, C, D*H*W): pure reshape, no transpose. Channels land on
    # sublanes, spatial on lanes.
    x3 = x_ncdhw.reshape(N, C, D * H * W)
    y3 = _fused_mlp(x3, params, ts_max=ts_max, matmul_dtype=matmul_dtype)
    out_dim = params[-1][0].shape[0]
    return y3.reshape(N, out_dim, D, H, W)


def reference_forward(x_ncdhw, params):
    """Pure-JAX reference (same math as the PyTorch Sequential)."""
    N, C, D, H, W = x_ncdhw.shape
    x = x_ncdhw.reshape(N, C, -1)
    for li, (w, b) in enumerate(params):
        x = jnp.einsum("oc,ncs->nos", w, x) + b[None, :, None]
        if li < len(params) - 1:
            x = jnp.maximum(x, 0.0)
    return x.reshape(N, -1, D, H, W)


if __name__ == "__main__":
    key = jax.random.PRNGKey(0)
    k_in, k_par = jax.random.split(key)

    # Small shapes implied by the module: Conv3d input is (N, C, D, H, W).
    N, in_dim, D, H, W = 2, 4, 16, 16, 16     # S = 4096 -> ts = 2048, grid (2, 2)
    hidden_list = [32, 32]
    out_dim = 3

    x = jax.random.normal(k_in, (N, in_dim, D, H, W), dtype=jnp.float32)
    params = init_params(k_par, in_dim, hidden_list, out_dim)

    y_ref = reference_forward(x, params)

    # 1) f32-matmul path: tight tolerance against the pure-JAX reference.
    y_f32 = jax.block_until_ready(
        linear_cnn_forward(x, params, matmul_dtype=jnp.float32))
    assert y_f32.shape == (N, out_dim, D, H, W), y_f32.shape
    assert jnp.allclose(y_f32, y_ref, atol=1e-5, rtol=1e-5), \
        "f32 path mismatch vs reference"

    # 2) default bf16-matmul path (perf): loose tolerance (bf16 mantissa).
    y_bf16 = jax.block_until_ready(linear_cnn_forward(x, params))
    assert y_bf16.shape == (N, out_dim, D, H, W), y_bf16.shape
    max_err = float(jnp.max(jnp.abs(y_bf16 - y_ref)))
    assert max_err < 5e-2, f"bf16 path mismatch vs reference: {max_err}"

    print("KERNEL_OK")
</pallas_src>

<mosaic_0001>
module attributes {stable_mosaic.version = 11 : i64} {
  func.func @_fused_mlp_kernel(%arg0: i32, %arg1: i32, %arg2: memref<1x4x2048xf32, #tpu.memory_space<vmem>>, %arg3: memref<32x4xf32, #tpu.memory_space<vmem>>, %arg4: memref<32x1xf32, #tpu.memory_space<vmem>>, %arg5: memref<32x32xf32, #tpu.memory_space<vmem>>, %arg6: memref<32x1xf32, #tpu.memory_space<vmem>>, %arg7: memref<3x32xf32, #tpu.memory_space<vmem>>, %arg8: memref<3x1xf32, #tpu.memory_space<vmem>>, %arg9: memref<1x3x2048xf32, #tpu.memory_space<vmem>>) attributes {dimension_semantics = [#tpu.dimension_semantics<parallel>, #tpu.dimension_semantics<parallel>], iteration_bounds = array<i64: 2, 2>, scalar_prefetch = 0 : i64, scratch_operands = 0 : i64, tpu.core_type = #tpu.core_type<tc>, window_params = [{transform_indices = @transform_0, window_bounds = array<i64: 1, 4, 2048>}, {pipeline_mode = #tpu.pipeline_mode<synchronous>, transform_indices = @transform_1, window_bounds = array<i64: 32, 4>}, {pipeline_mode = #tpu.pipeline_mode<synchronous>, transform_indices = @transform_2, window_bounds = array<i64: 32, 1>}, {pipeline_mode = #tpu.pipeline_mode<synchronous>, transform_indices = @transform_3, window_bounds = array<i64: 32, 32>}, {pipeline_mode = #tpu.pipeline_mode<synchronous>, transform_indices = @transform_4, window_bounds = array<i64: 32, 1>}, {pipeline_mode = #tpu.pipeline_mode<synchronous>, transform_indices = @transform_5, window_bounds = array<i64: 3, 32>}, {pipeline_mode = #tpu.pipeline_mode<synchronous>, transform_indices = @transform_6, window_bounds = array<i64: 3, 1>}, {transform_indices = @transform_7, window_bounds = array<i64: 1, 3, 2048>}]} {
    %c0 = arith.constant 0 : index
    %c0_0 = arith.constant 0 : index
    %c0_1 = arith.constant 0 : index
    %0 = vector.load %arg2[%c0, %c0_0, %c0_1] : memref<1x4x2048xf32, #tpu.memory_space<vmem>>, vector<1x4x2048xf32>
    %1 = vector.shape_cast %0 : vector<1x4x2048xf32> to vector<4x2048xf32>
    %c0_2 = arith.constant 0 : index
    %c0_3 = arith.constant 0 : index
    %2 = vector.load %arg3[%c0_2, %c0_3] : memref<32x4xf32, #tpu.memory_space<vmem>>, vector<32x4xf32>
    %c0_4 = arith.constant 0 : index
    %c0_5 = arith.constant 0 : index
    %3 = vector.load %arg4[%c0_4, %c0_5] : memref<32x1xf32, #tpu.memory_space<vmem>>, vector<32x1xf32>
    %cst = arith.constant dense<0.000000e+00> : vector<32x2048xf32>
    %4 = tpu.matmul %2, %1, %cst {dimension_numbers = #tpu.dot_dimension_numbers<[1], [0], [0], [1], [0, 0, 1, 1], [], []>} : vector<32x4xf32>, vector<4x2048xf32>, vector<32x2048xf32> -> vector<32x2048xf32>
    %5 = vector.broadcast %3 : vector<32x1xf32> to vector<32x2048xf32>
    %6 = arith.addf %4, %5 : vector<32x2048xf32>
    %cst_6 = arith.constant 0.000000e+00 : f32
    %7 = vector.broadcast %cst_6 : f32 to vector<32x2048xf32>
    %8 = arith.maximumf %6, %7 : vector<32x2048xf32>
    %c0_7 = arith.constant 0 : index
    %c0_8 = arith.constant 0 : index
    %9 = vector.load %arg5[%c0_7, %c0_8] : memref<32x32xf32, #tpu.memory_space<vmem>>, vector<32x32xf32>
    %c0_9 = arith.constant 0 : index
    %c0_10 = arith.constant 0 : index
    %10 = vector.load %arg6[%c0_9, %c0_10] : memref<32x1xf32, #tpu.memory_space<vmem>>, vector<32x1xf32>
    %cst_11 = arith.constant dense<0.000000e+00> : vector<32x2048xf32>
    %11 = tpu.matmul %9, %8, %cst_11 {dimension_numbers = #tpu.dot_dimension_numbers<[1], [0], [0], [1], [0, 0, 1, 1], [], []>} : vector<32x32xf32>, vector<32x2048xf32>, vector<32x2048xf32> -> vector<32x2048xf32>
    %12 = vector.broadcast %10 : vector<32x1xf32> to vector<32x2048xf32>
    %13 = arith.addf %11, %12 : vector<32x2048xf32>
    %cst_12 = arith.constant 0.000000e+00 : f32
    %14 = vector.broadcast %cst_12 : f32 to vector<32x2048xf32>
    %15 = arith.maximumf %13, %14 : vector<32x2048xf32>
    %c0_13 = arith.constant 0 : index
    %c0_14 = arith.constant 0 : index
    %16 = vector.load %arg7[%c0_13, %c0_14] : memref<3x32xf32, #tpu.memory_space<vmem>>, vector<3x32xf32>
    %c0_15 = arith.constant 0 : index
    %c0_16 = arith.constant 0 : index
    %17 = vector.load %arg8[%c0_15, %c0_16] : memref<3x1xf32, #tpu.memory_space<vmem>>, vector<3x1xf32>
    %cst_17 = arith.constant dense<0.000000e+00> : vector<3x2048xf32>
    %18 = tpu.matmul %16, %15, %cst_17 {dimension_numbers = #tpu.dot_dimension_numbers<[1], [0], [0], [1], [0, 0, 1, 1], [], []>} : vector<3x32xf32>, vector<32x2048xf32>, vector<3x2048xf32> -> vector<3x2048xf32>
    %19 = vector.broadcast %17 : vector<3x1xf32> to vector<3x2048xf32>
    %20 = arith.addf %18, %19 : vector<3x2048xf32>
    %c0_18 = arith.constant 0 : index
    %c0_19 = arith.constant 0 : index
    %c0_20 = arith.constant 0 : index
    %21 = vector.load %arg9[%c0_18, %c0_19, %c0_20] : memref<1x3x2048xf32, #tpu.memory_space<vmem>>, vector<1x3x2048xf32>
    %22 = vector.shape_cast %21 : vector<1x3x2048xf32> to vector<3x2048xf32>
    %23 = vector.shape_cast %20 : vector<3x2048xf32> to vector<1x3x2048xf32>
    tpu.vector_store %arg9[%c0_18, %c0_19, %c0_20], %23 {strides = array<i32>} : memref<1x3x2048xf32, #tpu.memory_space<vmem>>, vector<1x3x2048xf32>,
    return
  }
  func.func @transform_0(%arg0: i32, %arg1: i32) -> (i32, i32, i32) {
    %c0_i32 = arith.constant 0 : i32
    %c0_i32_0 = arith.constant 0 : i32
    return %arg0, %c0_i32, %arg1 : i32, i32, i32
  }
  func.func @transform_1(%arg0: i32, %arg1: i32) -> (i32, i32) {
    %c0_i32 = arith.constant 0 : i32
    %c0_i32_0 = arith.constant 0 : i32
    %c0_i32_1 = arith.constant 0 : i32
    return %c0_i32, %c0_i32_0 : i32, i32
  }
  func.func @transform_2(%arg0: i32, %arg1: i32) -> (i32, i32) {
    %c0_i32 = arith.constant 0 : i32
    %c0_i32_0 = arith.constant 0 : i32
    %c0_i32_1 = arith.constant 0 : i32
    return %c0_i32, %c0_i32_0 : i32, i32
  }
  func.func @transform_3(%arg0: i32, %arg1: i32) -> (i32, i32) {
    %c0_i32 = arith.constant 0 : i32
    %c0_i32_0 = arith.constant 0 : i32
    %c0_i32_1 = arith.constant 0 : i32
    return %c0_i32, %c0_i32_0 : i32, i32
  }
  func.func @transform_4(%arg0: i32, %arg1: i32) -> (i32, i32) {
    %c0_i32 = arith.constant 0 : i32
    %c0_i32_0 = arith.constant 0 : i32
    %c0_i32_1 = arith.constant 0 : i32
    return %c0_i32, %c0_i32_0 : i32, i32
  }
  func.func @transform_5(%arg0: i32, %arg1: i32) -> (i32, i32) {
    %c0_i32 = arith.constant 0 : i32
    %c0_i32_0 = arith.constant 0 : i32
    %c0_i32_1 = arith.constant 0 : i32
    return %c0_i32, %c0_i32_0 : i32, i32
  }
  func.func @transform_6(%arg0: i32, %arg1: i32) -> (i32, i32) {
    %c0_i32 = arith.constant 0 : i32
    %c0_i32_0 = arith.constant 0 : i32
    %c0_i32_1 = arith.constant 0 : i32
    return %c0_i32, %c0_i32_0 : i32, i32
  }
  func.func @transform_7(%arg0: i32, %arg1: i32) -> (i32, i32, i32) {
    %c0_i32 = arith.constant 0 : i32
    %c0_i32_0 = arith.constant 0 : i32
    return %arg0, %c0_i32, %arg1 : i32, i32, i32
  }
}

</mosaic_0001>

<bundles_post_ra>
// kernel: tpu_custom_call.1
= control target key start
LH: loop header
LB: loop body
LE: loop exit
PB: predicated region body
PF: predicated region fallthrough
CT: control target
= control target key end

     0   :  { %s3806_s0 = inlined_call_operand.hbm [shape: f32[2,4,4096], index: 0, kind: input, shape index: {}]   ;;  %s3807_s1 = inlined_call_operand.vmem [shape: f32[32,4], index: 1, kind: input, shape index: {}]   ;;  %s3808_s2 = inlined_call_operand.vmem [shape: f32[32,1], index: 2, kind: input, shape index: {}]   ;;  %s3809_s3 = inlined_call_operand.vmem [shape: f32[32,32], index: 3, kind: input, shape index: {}]   ;;  %s3810_s4 = inlined_call_operand.vmem [shape: f32[32,1], index: 4, kind: input, shape index: {}]   ;;  %s3811_s5 = inlined_call_operand.vmem [shape: f32[3,32], index: 5, kind: input, shape index: {}]   ;;  %s3812_s6 = inlined_call_operand.vmem [shape: f32[3,1], index: 6, kind: input, shape index: {}]   ;;  %s3813_s7 = inlined_call_operand.vmem [shape: f32[2,3,4096], index: 7, kind: output, shape index: {}]  }
   0x1   :  { %3817 = sst [smem:[#allocation8_spill]] %s3813_s7 }
   0x2   :  { %12 = vsyncpa [#allocation3], 0 }
   0x3   :  { %14 = vsyncpa [#allocation3 + $0x1], 0  ;;  %s3187_s24 = smov 0   ;;  %s3189_s25 = smov 0  }
   0x4   :  { %s3191_s26 = smov 0   ;;  %s3193_s27 = smov 0  }
   0x5   :  { %s3195_s28 = smov 0   ;;  %s3197_s29 = smov 0  }
   0x6   :  { %s3199_s30 = smov 0   ;;  %s3201_s8 = smov 0  }
   0x7 LB: > { %3818 = sst [smem:[#allocation5_spill]] %s3130_s28  ;;  %s2732_s9 = sadd.s32 4294967295, %s3142_s8   ;;  %s3142_s8 = sphi %s3201_s8, %s20_s8   ;;  %s3138_s30 = sphi %s3199_s30, %s3836_s30   ;;  %s3134_s29 = sphi %s3197_s29, %s3835_s29   ;;  %s3130_s28 = sphi %s3195_s28, %s3834_s28   ;;  %s3126_s27 = sphi %s3193_s27, %s3833_s27   ;;  %s3122_s26 = sphi %s3191_s26, %s3832_s26   ;;  %s3118_s25 = sphi %s3189_s25, %s3831_s25   ;;  %s3114_s24 = sphi %s3187_s24, %s3830_s24  }
   0x8   : > { %s29_s10 = sadd.s32 1, %s3134_s29  ;;  %s32_s11 = sadd.s32 1, %s3138_s30 }
   0x9   : > { %p30_p0 = scmp.ge.s32.totalorder %s29_s10, 2  ;;  %s41_s12 = sadd.s32 1, %s3122_s26 }
   0xa   : > { %p48_p1 = scmp.ne.s32.totalorder %s3122_s26, %s3118_s25  ;;  %p49_p2 = scmp.eq.s32.totalorder %s3142_s8, 0 }
   0xb   : > { %s3838_s10 = smov (%p30_p0, %s29_s10), 0  ;;  %s3840_s11 = smov (!%p30_p0, %s32_s11), %s3138_s30 }
   0xc   : > { %3819 = sst [smem:[#allocation6_spill]] %s3838_s10  ;;  %s37_s13 = ssub.s32 %s3134_s29, %s3838_s10 }
   0xd   : > { %p34_p3 = scmp.ge.s32.totalorder %s3840_s11, 2  ;;  %p54_p4 = scmp.ne.s32.totalorder %s3118_s25, %s3114_s24 }
   0xe   : > { %p3238_p5 = por %p49_p2, %p48_p1  ;;  %p55_p6 = scmp.eq.s32.totalorder %s2732_s9, 0 }
   0xf   : > { %s3842_s11 = smov (%p34_p3, %s3840_s11), 0  ;;  %p2969_p8 = scmp.lt.s32.totalorder %s3142_s8, 4 }
  0x10   : > { %3821 = sst [smem:[#allocation7_spill]] %s3842_s11  ;;  %p3244_p7 = por %p55_p6, %p54_p4 }
  0x11   : > { %s36_s16 = ssub.s32 %s3138_s30, %s3842_s11  ;;  %s250_s18 = sand.u32 1, %s3122_s26  }
  0x12   : > { %s38_s17 = sor.u32 %s37_s13, %s36_s16  ;;  %s2736_s19 = sshll.u32 %s250_s18, 6 }
  0x13   : > { %p39_p9 = scmp.eq.s32.totalorder %s38_s17, 0  ;;  %s2737_s20 = sshll.u32 %s3134_s29, 4 }
  0x14   : > { %s2738_s22 = sshll.u32 %s3138_s30, 5  ;;  %s254_s24 = scalar_lea.vmem [#allocation2], %s2736_s19 }
  0x15   : > { %s3254_s21 = scalar_select %p39_p9, %s3122_s26, %s41_s12  }
  0x16   : > { %s260_s23 = sadd.s32 %s2738_s22, %s2737_s20  ;;  %s264_s9 = sshll.u32 %s254_s24, 4  ;;  %s3257_s9 = int_to_ptr.vmem [resolvable:$true] %s264_s9 }
  0x17   : > { %s2739_s10 = sshll.u32 %s260_s23, 6  ;;  %p3268_p10 = pnand %p2969_p8, %p3238_p5 }
  0x18   : > { %s3262_s11 = scalar_lea.hbm %s3806_s0, %s2739_s10  ;;  %s251_s13 = scalar_lea.sflag [#allocation3], %s250_s18 }
  0x19   : > { %s3046_s16 = scalar_lea.hbm %s3262_s11, 1024  ;;  %p3048_p0 = pneg %p3268_p10 }
  0x1a   : > { %p3047_p13 = scmp.ne.s32.totalorder %s3262_s11, %s3046_s16  ;;  %s3051_s10 = scalar_lea.hbm %s3806_s0, 4096 }
  0x1b   : > { %p3052_p3 = scmp.lt.u32.totalorder %s3262_s11, %s3806_s0  ;;  %p3053_p4 = scmp.lt.u32.totalorder %s3051_s10, %s3046_s16 }
  0x1c   : > { %p3049_p1 = pnand %p3048_p0, %p3047_p13  ;;  %p3055_p6 = scmp.lt.u32.totalorder %s3046_s16, %s3262_s11 }
  0x1d   : > { %p3054_p5 = por %p3053_p4, %p3052_p3 }
  0x1e   : > { %p3050_p2 = pneg %p3049_p1 }
  0x1f   : > { %p3056_p8 = por %p3055_p6, %p3054_p5 }
  0x21   : > { %p3057_p9 = pnand %p3056_p8, %p3050_p2 }
  0x23   : > { %3060 = shalt.err (!%p3057_p9)
}
  0x24   : > { %s3061_s18 = scalar_lea.vmem %s3257_s9, 1024  ;;  %s3144_s19 = smov [#allocation2]  }
  0x25   : > { %p3062_p13 = scmp.ne.s32.totalorder %s3257_s9, %s3061_s18  ;;  %s3066_s20 = sshll.u32 %s3144_s19, 4  ;;  %s3067_s20 = int_to_ptr.vmem [resolvable:$false] %s3066_s20 }
  0x26   : > { %s3068_s22 = scalar_lea.vmem %s3067_s20, 2048  ;;  %p3069_p12 = scmp.lt.s32.totalorder %s3257_s9, %s3067_s20 }
  0x27   : > { %p3064_p1 = pnand %p3062_p13, %p3048_p0  ;;  %p3070_p3 = scmp.lt.s32.totalorder %s3068_s22, %s3061_s18 }
  0x29   : > { %p3065_p11 = pneg %p3064_p1  ;;  %p3071_p4 = por %p3070_p3, %p3069_p12 }
  0x2b   : > { %p3072_p5 = pnand %p3071_p4, %p3065_p11 }
  0x2d   : > { %3075 = shalt.err (!%p3072_p5)
}
  0x2e   : > { %2968 = dma.hbm_to_vmem [thread:$0]  (!%p3268_p10), %s3262_s11, 1024, %s3257_s9, %s251_s13  }
  0x2f   : > { %p3824_p2 = scmp.lt.s32.totalorder %s3142_s8, 5  ;;  %p3825_p6 = scmp.ge.s32.totalorder %s3142_s8, 1 }
  0x31   : > { %p270_p0 = pnand %p3825_p6, %p3824_p2 }
  0x32   : > { %s275_s23 = sand.u32 (!%p270_p0), 1, %s3118_s25  }
  0x33   : > { %273 = sbr.rel (%p270_p0) target bundleno = 802 (0x322), region = 48  ;;  %s2741_s24 = sshll.u32 (!%p270_p0), %s275_s23, 6 }
  0x34   : > { %s276_s16 = scalar_lea.sflag (!%p270_p0), [#allocation3], %s275_s23  ;;  %s3304_s7 = scalar_lea.vmem (!%p270_p0), [#allocation2], %s2741_s24 }
  0x3a   : > { %3109 = dma.done.wait (%p3244_p7), %s276_s16, 1024  }
  0x3b   : > { %3111 = vsyncadd (%p3244_p7), %s276_s16, 4294966272  ;;  %v3145_v0 = vmov 0.0   ;;  %v3146_v1 = vmov 0   ;;  %v325_v2 = vld [vmem:[%s3304_s7] sm:$0xff]  ;;  %vm390_vm0 = vcmask 1043456   ;;  %v326_v3 = vld [vmem:[%s3304_s7 + $0x8] sm:$0xff] }
  0x3c   : > { %487 = vmatprep.mubr.f32.mxu0 %v3145_v0  ;;  %576 = vmatprep.mubr.f32.mxu1 %v3145_v0  ;;  %v369_v4 = vcombine.high %v325_v2, %v325_v2  ;;  %v370_v5 = vcombine.high %v326_v3, %v326_v3  ;;  %v327_v6 = vld [vmem:[%s3304_s7 + $0x10] sm:$0xff]  ;;  %v328_v7 = vld [vmem:[%s3304_s7 + $0x18] sm:$0xff]  ;;  %v3319_v8 = vld [vmem:[%s3807_s1] sm:$0xff]  ;;  %vm377_vm1 = vcmask 31744   ;;  %vm1227_vm2 = vcmask 261120   ;;  %s3826_s12 = sld [smem:[#allocation5_spill]] }
  0x3d   : > { %3036 = vset.pattern.permute.xlu0 %v3146_v1  ;;  %3037 = vset.pattern.permute.xlu1 %v3146_v1  ;;  %v371_v9 = vcombine.high %v327_v6, %v327_v6  ;;  %v372_v10 = vcombine.high %v328_v7, %v328_v7  ;;  %v329_v11 = vld [vmem:[%s3304_s7 + $0x20] sm:$0xff]  ;;  %v330_v12 = vld [vmem:[%s3304_s7 + $0x28] sm:$0xff]  ;;  %v339_v17 = vld [vmem:[%s3808_s2 + $0x10] sm:$0xff]  ;;  %s3827_s18 = sld [smem:[#allocation8_spill]] }
  0x3e   : > { %2745 = vmatprep.subr.msk.mxu0 %vm390_vm0, %v369_v4  ;;  %2751 = vmatprep.subr.msk.mxu1 %vm390_vm0, %v370_v5  ;;  %v3336_v13 = vld [vmem:[%s3807_s1 + $0x8] sm:$0xff]  ;;  %v373_v14 = vcombine.high %v329_v11, %v329_v11  ;;  %v374_v15 = vcombine.high %v330_v12, %v330_v12  ;;  %v337_v16 = vld [vmem:[%s3808_s2] sm:$0xff]  ;;  %v3357_v18 = vld [vmem:[%s3807_s1 + $0x10] sm:$0xff] }
  0x3f   : > { %2746 = vmatpush1.msk.msra.mxu0 %vm390_vm0, %v325_v2  ;;  %2752 = vmatpush1.msk.msra.mxu1 %vm390_vm0, %v326_v3  ;;  %v338_v19 = vld [vmem:[%s3808_s2 + $0x8] sm:$0xff]  ;;  %v340_v20 = vld [vmem:[%s3808_s2 + $0x18] sm:$0xff]  ;;  %v331_v22 = vld [vmem:[%s3304_s7 + $0x30] sm:$0xff] }
  0x40   : > { %2747 = vmatmul.mubr.msk.f32.vlgmr.msra.gmra.mrb[0].mxu0 %vm377_vm1, %v3319_v8  ;;  %2753 = vmatmul.mubr.msk.f32.vlgmr.msra.gmra.mrb[0].mxu1 %vm377_vm1, %v3319_v8  ;;  %v3376_v21 = vld [vmem:[%s3807_s1 + $0x18] sm:$0xff]  ;;  %v1203_v24 = vld [vmem:[%s3810_s4] sm:$0xff]  ;;  %v1204_v25 = vld [vmem:[%s3810_s4 + $0x8] sm:$0xff]  ;;  %v375_v26 = vcombine.high %v331_v22, %v331_v22 }
  0x41   : > { %493 = vmatprep.mubr.f32.mxu0 %v3145_v0  ;;  %582 = vmatprep.mubr.f32.mxu1 %v3145_v0  ;;  %v332_v23 = vld [vmem:[%s3304_s7 + $0x38] sm:$0xff]  ;;  %v1205_v28 = vld [vmem:[%s3810_s4 + $0x10] sm:$0xff]  ;;  %v2017_v30 = vld [vmem:[%s3812_s6] sm:$0x7]  ;;  %s2742_s7 = sshll.u32 %s3126_s27, 4 }
  0x42   : > { %2757 = vmatprep.subr.msk.mxu0 %vm390_vm0, %v371_v9  ;;  %2763 = vmatprep.subr.msk.mxu1 %vm390_vm0, %v372_v10  ;;  %v376_v27 = vcombine.high %v332_v23, %v332_v23  ;;  %v1206_v29 = vld [vmem:[%s3810_s4 + $0x18] sm:$0xff]  ;;  %p316_p7 = scmp.lt.s32.totalorder %s3826_s12, 1  ;;  %p318_p10 = scmp.lt.s32.totalorder %s2742_s7, 31 }
  0x43   : > { %2758 = vmatpush1.msk.msra.mxu0 %vm390_vm0, %v327_v6  ;;  %2764 = vmatpush1.msk.msra.mxu1 %vm390_vm0, %v328_v7 }
  0x44   : > { %2748 = vmatmul.mubr.msk.f32.gmra.mrb[2].mxu0 %vm377_vm1, %v3336_v13  ;;  %2754 = vmatmul.mubr.msk.f32.gmra.mrb[2].mxu1 %vm377_vm1, %v3336_v13  ;;  %s3844_s12 = smov (!%p316_p7, %s3826_s12), 1  ;;  %s3846_s7 = smov (!%p318_p10, %s2742_s7), 31 }
  0x45   : > { %499 = vmatprep.mubr.f32.mxu0 %v3145_v0  ;;  %588 = vmatprep.mubr.f32.mxu1 %v3145_v0  ;;  %s2743_s13 = sshll.u32 %s3844_s12, 5 }
  0x46   : > { %2769 = vmatprep.subr.msk.mxu0 %vm390_vm0, %v373_v14  ;;  %2775 = vmatprep.subr.msk.mxu1 %vm390_vm0, %v374_v15  ;;  %s321_s28 = sadd.s32 %s2743_s13, %s3846_s7 }
  0x47   : > { %343 = vperm.xlu0 %3036, %v337_v16   ;;  %353 = vperm.xlu1 %3037, %v339_v17   ;;  %s2744_s10 = sshll.u32 %s321_s28, 2 }
  0x48   : > { %2749 = vmatmul.mubr.msk.f32.gmra.mrb[4].mxu0 %vm377_vm1, %v3357_v18  ;;  %2755 = vmatmul.mubr.msk.f32.gmra.mrb[4].mxu1 %vm377_vm1, %v3357_v18  ;;  %s3772_s27 = scalar_lea.vmem %s3827_s18, %s2744_s10 }
  0x49   : > { %505 = vmatprep.mubr.f32.mxu0 %v3145_v0  ;;  %594 = vmatprep.mubr.f32.mxu1 %v3145_v0 }
  0x4b   : > { %348 = vperm.xlu0 %3036, %v338_v19   ;;  %358 = vperm.xlu1 %3037, %v340_v20  }
  0x4c   : > { %2750 = vmatmul.mubr.msk.f32.gmra.mrb[6].mxu0 %vm377_vm1, %v3376_v21  ;;  %2756 = vmatmul.mubr.msk.f32.gmra.mrb[6].mxu1 %vm377_vm1, %v3376_v21 }
  0x4d   : > { %665 = vmatprep.mubr.f32.mxu0 %v3145_v0  ;;  %754 = vmatprep.mubr.f32.mxu1 %v3145_v0 }
  0x4f   : > { %1209 = vperm.xlu0 %3036, %v1203_v24   ;;  %1214 = vperm.xlu1 %3037, %v1204_v25  }
  0x50   : > { %2759 = vmatmul.mubr.msk.f32.vlgmr.msra.gmra.mrb[8].mxu0 %vm377_vm1, %v3319_v8  ;;  %2765 = vmatmul.mubr.msk.f32.vlgmr.msra.gmra.mrb[8].mxu1 %vm377_vm1, %v3319_v8 }
  0x51   : > { %671 = vmatprep.mubr.f32.mxu0 %v3145_v0  ;;  %760 = vmatprep.mubr.f32.mxu1 %v3145_v0 }
  0x52   : > { %2770 = vmatpush1.msk.msra.mxu0 %vm390_vm0, %v329_v11  ;;  %2776 = vmatpush1.msk.msra.mxu1 %vm390_vm0, %v330_v12 }
  0x53   : > { %2781 = vmatprep.subr.msk.mxu0 %vm390_vm0, %v375_v26  ;;  %2787 = vmatprep.subr.msk.mxu1 %vm390_vm0, %v376_v27 }
  0x54   : > { %2760 = vmatmul.mubr.msk.f32.gmra.mrb[10].mxu0 %vm377_vm1, %v3336_v13  ;;  %2766 = vmatmul.mubr.msk.f32.gmra.mrb[10].mxu1 %vm377_vm1, %v3336_v13 }
  0x55   : > { %677 = vmatprep.mubr.f32.mxu0 %v3145_v0  ;;  %766 = vmatprep.mubr.f32.mxu1 %v3145_v0 }
  0x56   : > { %1219 = vperm.xlu0 %3036, %v1205_v28   ;;  %1224 = vperm.xlu1 %3037, %v1206_v29  }
  0x58   : > { %2761 = vmatmul.mubr.msk.f32.gmra.mrb[12].mxu0 %vm377_vm1, %v3357_v18  ;;  %2767 = vmatmul.mubr.msk.f32.gmra.mrb[12].mxu1 %vm377_vm1, %v3357_v18 }
  0x59   : > { %683 = vmatprep.mubr.f32.mxu0 %v3145_v0  ;;  %772 = vmatprep.mubr.f32.mxu1 %v3145_v0 }
  0x5a   : > { %2020 = vperm.xlu0 %3036, %v2017_v30  }
  0x5c   : > { %2762 = vmatmul.mubr.msk.f32.gmra.mrb[14].mxu0 %vm377_vm1, %v3376_v21  ;;  %2768 = vmatmul.mubr.msk.f32.gmra.mrb[14].mxu1 %vm377_vm1, %v3376_v21 }
  0x5d   : > { %843 = vmatprep.mubr.f32.mxu0 %v3145_v0  ;;  %932 = vmatprep.mubr.f32.mxu1 %v3145_v0 }
  0x60   : > { %2771 = vmatmul.mubr.msk.f32.vlgmr.msra.gmra.mrb[16].mxu0 %vm377_vm1, %v3319_v8  ;;  %2777 = vmatmul.mubr.msk.f32.vlgmr.msra.gmra.mrb[16].mxu1 %vm377_vm1, %v3319_v8 }
  0x61   : > { %849 = vmatprep.mubr.f32.mxu0 %v3145_v0  ;;  %938 = vmatprep.mubr.f32.mxu1 %v3145_v0 }
  0x62   : > { %2782 = vmatpush1.msk.msra.mxu0 %vm390_vm0, %v331_v22  ;;  %2788 = vmatpush1.msk.msra.mxu1 %vm390_vm0, %v332_v23 }
  0x64   : > { %2772 = vmatmul.mubr.msk.f32.gmra.mrb[18].mxu0 %vm377_vm1, %v3336_v13  ;;  %2778 = vmatmul.mubr.msk.f32.gmra.mrb[18].mxu1 %vm377_vm1, %v3336_v13 }
  0x65   : > { %855 = vmatprep.mubr.f32.mxu0 %v3145_v0  ;;  %944 = vmatprep.mubr.f32.mxu1 %v3145_v0 }
  0x68   : > { %2773 = vmatmul.mubr.msk.f32.gmra.mrb[20].mxu0 %vm377_vm1, %v3357_v18  ;;  %2779 = vmatmul.mubr.msk.f32.gmra.mrb[20].mxu1 %vm377_vm1, %v3357_v18 }
  0x69   : > { %861 = vmatprep.mubr.f32.mxu0 %v3145_v0  ;;  %950 = vmatprep.mubr.f32.mxu1 %v3145_v0 }
  0x6c   : > { %2774 = vmatmul.mubr.msk.f32.gmra.mrb[22].mxu0 %vm377_vm1, %v3376_v21  ;;  %2780 = vmatmul.mubr.msk.f32.gmra.mrb[22].mxu1 %vm377_vm1, %v3376_v21 }
  0x6d   : > { %1021 = vmatprep.mubr.f32.mxu0 %v3145_v0  ;;  %1110 = vmatprep.mubr.f32.mxu1 %v3145_v0 }
  0x70   : > { %2783 = vmatmul.mubr.msk.f32.vlgmr.msra.gmra.mrb[24].mxu0 %vm377_vm1, %v3319_v8  ;;  %2789 = vmatmul.mubr.msk.f32.vlgmr.msra.gmra.mrb[24].mxu1 %vm377_vm1, %v3319_v8 }
  0x71   : > { %1027 = vmatprep.mubr.f32.mxu0 %v3145_v0  ;;  %1116 = vmatprep.mubr.f32.mxu1 %v3145_v0 }
  0x74   : > { %2784 = vmatmul.mubr.msk.f32.gmra.mrb[26].mxu0 %vm377_vm1, %v3336_v13  ;;  %2790 = vmatmul.mubr.msk.f32.gmra.mrb[26].mxu1 %vm377_vm1, %v3336_v13 }
  0x75   : > { %1033 = vmatprep.mubr.f32.mxu0 %v3145_v0  ;;  %1122 = vmatprep.mubr.f32.mxu1 %v3145_v0 }
  0x78   : > { %2785 = vmatmul.mubr.msk.f32.gmra.mrb[28].mxu0 %vm377_vm1, %v3357_v18  ;;  %2791 = vmatmul.mubr.msk.f32.gmra.mrb[28].mxu1 %vm377_vm1, %v3357_v18 }
  0x79   : > { %1039 = vmatprep.mubr.f32.mxu0 %v3145_v0  ;;  %1128 = vmatprep.mubr.f32.mxu1 %v3145_v0 }
  0x7c   : > { %2786 = vmatmul.mubr.msk.f32.gmra.mrb[30].mxu0 %vm377_vm1, %v3376_v21  ;;  %2792 = vmatmul.mubr.msk.f32.gmra.mrb[30].mxu1 %vm377_vm1, %v3376_v21 }
  0x7d   : > { %1304 = vmatprep.mubr.f32.mxu0 %v3145_v0  ;;  %1393 = vmatprep.mubr.f32.mxu1 %v3145_v0 }
  0xc6   : > { %v3479_v31 = vpop.permute.xlu0 %343  ;;  %v3483_v37 = vpop.permute.xlu1 %353 }
  0xca   : > { %v3481_v36 = vpop.permute.xlu0 %348  ;;  %v3493_v3 = vpop.permute.xlu1 %358 }
 0x113   : > { %v489_v32 = vpop.f32.mrb[0].mxu0  ;;  %v578_v33 = vpop.f32.mrb[0].mxu1 }
 0x114   : > { %v491_v34 = vpop.f32.mrb[1].mxu0  ;;  %v580_v35 = vpop.f32.mrb[1].mxu1  ;;  %v490_v38 = vadd.f32 %v489_v32, %v3479_v31  ;;  %v579_v39 = vadd.f32 %v578_v33, %v3479_v31 }
 0x115   : > { %v492_v40 = vadd.f32 %v491_v34, %v3479_v31  ;;  %v581_v41 = vadd.f32 %v580_v35, %v3479_v31 }
 0x116   : > { %v1135_v50 = vmax.f32 %v490_v38, 0.0  ;;  %v1137_v51 = vmax.f32 %v579_v39, 0.0 }
 0x117   : > { %v495_v42 = vpop.f32.mrb[2].mxu0  ;;  %v584_v43 = vpop.f32.mrb[2].mxu1  ;;  %v1136_v54 = vmax.f32 %v492_v40, 0.0  ;;  %v1138_v55 = vmax.f32 %v581_v41, 0.0 }
 0x118   : > { %v496_v44 = vadd.f32 %v495_v42, %v3481_v36  ;;  %v585_v45 = vadd.f32 %v584_v43, %v3481_v36  ;;  %v497_v46 = vpop.f32.mrb[3].mxu0  ;;  %v586_v47 = vpop.f32.mrb[3].mxu1 }
 0x119   : > { %v498_v48 = vadd.f32 %v497_v46, %v3481_v36  ;;  %v587_v49 = vadd.f32 %v586_v47, %v3481_v36 }
 0x11a   : > { %v1151_v52 = vmax.f32 %v496_v44, 0.0  ;;  %v1153_v53 = vmax.f32 %v585_v45, 0.0  ;;  %v3512_v45 = vld [vmem:[%s3809_s3] sm:$0xff] }
 0x11b   : > { %v1152_v56 = vmax.f32 %v498_v48, 0.0  ;;  %v1154_v57 = vmax.f32 %v587_v49, 0.0  ;;  %v501_v58 = vpop.f32.mrb[4].mxu0  ;;  %v590_v59 = vpop.f32.mrb[4].mxu1 }
 0x11c   : > { %v2837_v60 = vpack.c.bf16 %v1151_v52, %v1135_v50  ;;  %v2845_v61 = vpack.c.bf16 %v1153_v53, %v1137_v51  ;;  %v503_v62 = vpop.f32.mrb[5].mxu0  ;;  %v592_v63 = vpop.f32.mrb[5].mxu1  ;;  %v502_v4 = vadd.f32 %v501_v58, %v3483_v37  ;;  %v591_v5 = vadd.f32 %v590_v59, %v3483_v37 }
 0x11d   : > { %v2835_v1 = vpack.c.bf16 %v1152_v56, %v1136_v54  ;;  %v2843_v2 = vpack.c.bf16 %v1154_v57, %v1138_v55  ;;  %v504_v6 = vadd.f32 %v503_v62, %v3483_v37  ;;  %v593_v7 = vadd.f32 %v592_v63, %v3483_v37  ;;  %v3524_v62 = vld [vmem:[%s3809_s3 + $0x8] sm:$0xff] }
 0x11e   : > { %v1167_v16 = vmax.f32 %v502_v4, 0.0  ;;  %v1169_v17 = vmax.f32 %v591_v5, 0.0 }
 0x11f   : > { %v507_v8 = vpop.f32.mrb[6].mxu0  ;;  %v596_v9 = vpop.f32.mrb[6].mxu1  ;;  %2836 = vmatprep.subr.bf16.mxu0 %v2835_v1  ;;  %2844 = vmatprep.subr.bf16.mxu1 %v2843_v2  ;;  %v1168_v20 = vmax.f32 %v504_v6, 0.0  ;;  %v1170_v21 = vmax.f32 %v593_v7, 0.0 }
 0x120   : > { %v508_v10 = vadd.f32 %v507_v8, %v3493_v3  ;;  %v597_v11 = vadd.f32 %v596_v9, %v3493_v3  ;;  %v509_v12 = vpop.f32.mrb[7].mxu0  ;;  %v598_v13 = vpop.f32.mrb[7].mxu1  ;;  %2838 = vmatpush1.bf16.msra.mxu0 %v2837_v60  ;;  %2846 = vmatpush1.bf16.msra.mxu1 %v2845_v61 }
 0x121   : > { %v510_v14 = vadd.f32 %v509_v12, %v3493_v3  ;;  %v599_v15 = vadd.f32 %v598_v13, %v3493_v3  ;;  %v3540_v13 = vld [vmem:[%s3809_s3 + $0x10] sm:$0xff] }
 0x122   : > { %v1183_v18 = vmax.f32 %v508_v10, 0.0  ;;  %v1185_v19 = vmax.f32 %v597_v11, 0.0 }
 0x123   : > { %v1184_v22 = vmax.f32 %v510_v14, 0.0  ;;  %v1186_v23 = vmax.f32 %v599_v15, 0.0  ;;  %v667_v24 = vpop.f32.mrb[8].mxu0  ;;  %v756_v25 = vpop.f32.mrb[8].mxu1 }
 0x124   : > { %v2841_v26 = vpack.c.bf16 %v1183_v18, %v1167_v16  ;;  %v2849_v27 = vpack.c.bf16 %v1185_v19, %v1169_v17  ;;  %v669_v28 = vpop.f32.mrb[9].mxu0  ;;  %v758_v29 = vpop.f32.mrb[9].mxu1  ;;  %v668_v33 = vadd.f32 %v667_v24, %v3479_v31  ;;  %v757_v34 = vadd.f32 %v756_v25, %v3479_v31 }
 0x125   : > { %v2839_v30 = vpack.c.bf16 %v1184_v22, %v1168_v20  ;;  %v2847_v32 = vpack.c.bf16 %v1186_v23, %v1170_v21  ;;  %v670_v35 = vadd.f32 %v669_v28, %v3479_v31  ;;  %v759_v38 = vadd.f32 %v758_v29, %v3479_v31 }
 0x126   : > { %v1139_v48 = vmax.f32 %v668_v33, 0.0  ;;  %v1141_v49 = vmax.f32 %v757_v34, 0.0 }
 0x127   : > { %v673_v39 = vpop.f32.mrb[10].mxu0  ;;  %v762_v40 = vpop.f32.mrb[10].mxu1  ;;  %2840 = vmatprep.subr.bf16.mxu0 %v2839_v30  ;;  %2848 = vmatprep.subr.bf16.mxu1 %v2847_v32  ;;  %v1140_v52 = vmax.f32 %v670_v35, 0.0  ;;  %v1142_v53 = vmax.f32 %v759_v38, 0.0  ;;  %v3554_v30 = vld [vmem:[%s3809_s3 + $0x18] sm:$0xff] }
 0x128   : > { %v674_v41 = vadd.f32 %v673_v39, %v3481_v36  ;;  %v763_v42 = vadd.f32 %v762_v40, %v3481_v36  ;;  %v675_v43 = vpop.f32.mrb[11].mxu0  ;;  %v764_v44 = vpop.f32.mrb[11].mxu1  ;;  %2842 = vmatpush1.bf16.msra.mxu0 %v2841_v26  ;;  %2850 = vmatpush1.bf16.msra.mxu1 %v2849_v27 }
 0x129   : > { %v676_v46 = vadd.f32 %v675_v43, %v3481_v36  ;;  %v765_v47 = vadd.f32 %v764_v44, %v3481_v36 }
 0x12a   : > { %v1155_v50 = vmax.f32 %v674_v41, 0.0  ;;  %v1157_v51 = vmax.f32 %v763_v42, 0.0 }
 0x12b   : > { %v1156_v54 = vmax.f32 %v676_v46, 0.0  ;;  %v1158_v55 = vmax.f32 %v765_v47, 0.0  ;;  %v679_v56 = vpop.f32.mrb[12].mxu0  ;;  %v768_v57 = vpop.f32.mrb[12].mxu1  ;;  %2793 = vmatmul.mubr.msk.f32.vlgmr.msra.gmra.mrb[32].mxu0 %vm1227_vm2, %v3512_v45  ;;  %2797 = vmatmul.mubr.msk.f32.vlgmr.msra.gmra.mrb[32].mxu1 %vm1227_vm2, %v3512_v45 }
 0x12c   : > { %v2853_v58 = vpack.c.bf16 %v1155_v50, %v1139_v48  ;;  %v2861_v59 = vpack.c.bf16 %v1157_v51, %v1141_v49  ;;  %v681_v60 = vpop.f32.mrb[13].mxu0  ;;  %v770_v61 = vpop.f32.mrb[13].mxu1  ;;  %1310 = vmatprep.mubr.f32.mxu0 %v3145_v0  ;;  %1399 = vmatprep.mubr.f32.mxu1 %v3145_v0  ;;  %v680_v2 = vadd.f32 %v679_v56, %v3483_v37 }
 0x12d   : > { %v2851_v63 = vpack.c.bf16 %v1156_v54, %v1140_v52  ;;  %v2859_v1 = vpack.c.bf16 %v1158_v55, %v1142_v53  ;;  %v769_v4 = vadd.f32 %v768_v57, %v3483_v37  ;;  %v682_v5 = vadd.f32 %v681_v60, %v3483_v37 }
 0x12e   : > { %v771_v6 = vadd.f32 %v770_v61, %v3483_v37  ;;  %v1171_v16 = vmax.f32 %v680_v2, 0.0 }
 0x12f   : > { %v685_v7 = vpop.f32.mrb[14].mxu0  ;;  %v774_v8 = vpop.f32.mrb[14].mxu1  ;;  %2794 = vmatmul.mubr.msk.f32.gmra.mrb[34].mxu0 %vm1227_vm2, %v3524_v62  ;;  %2798 = vmatmul.mubr.msk.f32.gmra.mrb[34].mxu1 %vm1227_vm2, %v3524_v62  ;;  %v1173_v17 = vmax.f32 %v769_v4, 0.0  ;;  %v1172_v20 = vmax.f32 %v682_v5, 0.0 }
 0x130   : > { %v686_v9 = vadd.f32 %v685_v7, %v3493_v3  ;;  %v775_v10 = vadd.f32 %v774_v8, %v3493_v3  ;;  %2852 = vmatprep.subr.bf16.mxu0 %v2851_v63  ;;  %2860 = vmatprep.subr.bf16.mxu1 %v2859_v1  ;;  %v687_v11 = vpop.f32.mrb[15].mxu0  ;;  %v776_v12 = vpop.f32.mrb[15].mxu1  ;;  %v1174_v21 = vmax.f32 %v771_v6, 0.0 }
 0x131   : > { %v688_v14 = vadd.f32 %v687_v11, %v3493_v3  ;;  %v777_v15 = vadd.f32 %v776_v12, %v3493_v3  ;;  %2854 = vmatpush1.bf16.msra.mxu0 %v2853_v58  ;;  %2862 = vmatpush1.bf16.msra.mxu1 %v2861_v59 }
 0x132   : > { %v1187_v18 = vmax.f32 %v686_v9, 0.0  ;;  %v1189_v19 = vmax.f32 %v775_v10, 0.0  ;;  %1316 = vmatprep.mubr.f32.mxu0 %v3145_v0  ;;  %1405 = vmatprep.mubr.f32.mxu1 %v3145_v0 }
 0x133   : > { %v1188_v22 = vmax.f32 %v688_v14, 0.0  ;;  %v1190_v23 = vmax.f32 %v777_v15, 0.0  ;;  %v845_v24 = vpop.f32.mrb[16].mxu0  ;;  %v934_v25 = vpop.f32.mrb[16].mxu1  ;;  %2795 = vmatmul.mubr.msk.f32.gmra.mrb[36].mxu0 %vm1227_vm2, %v3540_v13  ;;  %2799 = vmatmul.mubr.msk.f32.gmra.mrb[36].mxu1 %vm1227_vm2, %v3540_v13 }
 0x134   : > { %v2857_v26 = vpack.c.bf16 %v1187_v18, %v1171_v16  ;;  %v2865_v27 = vpack.c.bf16 %v1189_v19, %v1173_v17  ;;  %v847_v28 = vpop.f32.mrb[17].mxu0  ;;  %v936_v29 = vpop.f32.mrb[17].mxu1  ;;  %1322 = vmatprep.mubr.f32.mxu0 %v3145_v0  ;;  %1411 = vmatprep.mubr.f32.mxu1 %v3145_v0  ;;  %v846_v34 = vadd.f32 %v845_v24, %v3479_v31 }
 0x135   : > { %v2855_v32 = vpack.c.bf16 %v1188_v22, %v1172_v20  ;;  %v2863_v33 = vpack.c.bf16 %v1190_v23, %v1174_v21  ;;  %v935_v35 = vadd.f32 %v934_v25, %v3479_v31  ;;  %v848_v38 = vadd.f32 %v847_v28, %v3479_v31 }
 0x136   : > { %v937_v39 = vadd.f32 %v936_v29, %v3479_v31  ;;  %v1143_v49 = vmax.f32 %v846_v34, 0.0 }
 0x137   : > { %v851_v40 = vpop.f32.mrb[18].mxu0  ;;  %v940_v41 = vpop.f32.mrb[18].mxu1  ;;  %2796 = vmatmul.mubr.msk.f32.gmra.mrb[38].mxu0 %vm1227_vm2, %v3554_v30  ;;  %2800 = vmatmul.mubr.msk.f32.gmra.mrb[38].mxu1 %vm1227_vm2, %v3554_v30  ;;  %v1145_v50 = vmax.f32 %v935_v35, 0.0  ;;  %v1144_v53 = vmax.f32 %v848_v38, 0.0 }
 0x138   : > { %v852_v42 = vadd.f32 %v851_v40, %v3481_v36  ;;  %v941_v43 = vadd.f32 %v940_v41, %v3481_v36  ;;  %2856 = vmatprep.subr.bf16.mxu0 %v2855_v32  ;;  %2864 = vmatprep.subr.bf16.mxu1 %v2863_v33  ;;  %v853_v44 = vpop.f32.mrb[19].mxu0  ;;  %v942_v46 = vpop.f32.mrb[19].mxu1  ;;  %v1146_v54 = vmax.f32 %v937_v39, 0.0 }
 0x139   : > { %v854_v47 = vadd.f32 %v853_v44, %v3481_v36  ;;  %v943_v48 = vadd.f32 %v942_v46, %v3481_v36  ;;  %2858 = vmatpush1.bf16.msra.mxu0 %v2857_v26  ;;  %2866 = vmatpush1.bf16.msra.mxu1 %v2865_v27 }
 0x13a   : > { %v1159_v51 = vmax.f32 %v852_v42, 0.0  ;;  %v1161_v52 = vmax.f32 %v941_v43, 0.0  ;;  %1482 = vmatprep.mubr.f32.mxu0 %v3145_v0  ;;  %1571 = vmatprep.mubr.f32.mxu1 %v3145_v0 }
 0x13b   : > { %v1160_v55 = vmax.f32 %v854_v47, 0.0  ;;  %v1162_v56 = vmax.f32 %v943_v48, 0.0  ;;  %v857_v57 = vpop.f32.mrb[20].mxu0  ;;  %v946_v58 = vpop.f32.mrb[20].mxu1 }
 0x13c   : > { %v2869_v59 = vpack.c.bf16 %v1159_v51, %v1143_v49  ;;  %v2877_v60 = vpack.c.bf16 %v1161_v52, %v1145_v50  ;;  %2801 = vmatmul.mubr.msk.f32.vlgmr.msra.gmra.mrb[40].mxu0 %vm1227_vm2, %v3512_v45  ;;  %v859_v61 = vpop.f32.mrb[21].mxu0  ;;  %v948_v63 = vpop.f32.mrb[21].mxu1  ;;  %2805 = vmatmul.mubr.msk.f32.vlgmr.msra.gmra.mrb[40].mxu1 %vm1227_vm2, %v3512_v45  ;;  %v858_v4 = vadd.f32 %v857_v57, %v3483_v37 }
 0x13d   : > { %v2867_v1 = vpack.c.bf16 %v1160_v55, %v1144_v53  ;;  %v2875_v2 = vpack.c.bf16 %v1162_v56, %v1146_v54  ;;  %v947_v5 = vadd.f32 %v946_v58, %v3483_v37  ;;  %1488 = vmatprep.mubr.f32.mxu0 %v3145_v0  ;;  %1577 = vmatprep.mubr.f32.mxu1 %v3145_v0 }
 0x13e   : > { %v860_v6 = vadd.f32 %v859_v61, %v3483_v37  ;;  %v949_v7 = vadd.f32 %v948_v63, %v3483_v37  ;;  %v1175_v17 = vmax.f32 %v858_v4, 0.0 }
 0x13f   : > { %v863_v8 = vpop.f32.mrb[22].mxu0  ;;  %v952_v9 = vpop.f32.mrb[22].mxu1  ;;  %2868 = vmatprep.subr.bf16.mxu0 %v2867_v1  ;;  %2876 = vmatprep.subr.bf16.mxu1 %v2875_v2  ;;  %v1177_v18 = vmax.f32 %v947_v5, 0.0 }
 0x140   : > { %v864_v10 = vadd.f32 %v863_v8, %v3493_v3  ;;  %v953_v11 = vadd.f32 %v952_v9, %v3493_v3  ;;  %2802 = vmatmul.mubr.msk.f32.gmra.mrb[42].mxu0 %vm1227_vm2, %v3524_v62  ;;  %v865_v12 = vpop.f32.mrb[23].mxu0  ;;  %v954_v14 = vpop.f32.mrb[23].mxu1  ;;  %2878 = vmatpush1.bf16.msra.mxu1 %v2877_v60  ;;  %v1176_v21 = vmax.f32 %v860_v6, 0.0  ;;  %v1178_v22 = vmax.f32 %v949_v7, 0.0 }
 0x141   : > { %2806 = vmatmul.mubr.msk.f32.gmra.mrb[42].mxu1 %vm1227_vm2, %v3524_v62  ;;  %v866_v15 = vadd.f32 %v865_v12, %v3493_v3  ;;  %v955_v16 = vadd.f32 %v954_v14, %v3493_v3  ;;  %2870 = vmatpush1.bf16.msra.mxu0 %v2869_v59 }
 0x142   : > { %v1191_v19 = vmax.f32 %v864_v10, 0.0  ;;  %v1193_v20 = vmax.f32 %v953_v11, 0.0  ;;  %1494 = vmatprep.mubr.f32.mxu0 %v3145_v0  ;;  %1583 = vmatprep.mubr.f32.mxu1 %v3145_v0 }
 0x143   : > { %v1192_v23 = vmax.f32 %v866_v15, 0.0  ;;  %v1194_v24 = vmax.f32 %v955_v16, 0.0  ;;  %v1023_v25 = vpop.f32.mrb[24].mxu0  ;;  %v1112_v26 = vpop.f32.mrb[24].mxu1 }
 0x144   : > { %v2873_v27 = vpack.c.bf16 %v1191_v19, %v1175_v17  ;;  %v2881_v28 = vpack.c.bf16 %v1193_v20, %v1177_v18  ;;  %2803 = vmatmul.mubr.msk.f32.gmra.mrb[44].mxu0 %vm1227_vm2, %v3540_v13  ;;  %v1025_v29 = vpop.f32.mrb[25].mxu0  ;;  %v1114_v32 = vpop.f32.mrb[25].mxu1  ;;  %v1024_v35 = vadd.f32 %v1023_v25, %v3479_v31  ;;  %v1113_v38 = vadd.f32 %v1112_v26, %v3479_v31 }
 0x145   : > { %v2871_v33 = vpack.c.bf16 %v1192_v23, %v1176_v21  ;;  %v2879_v34 = vpack.c.bf16 %v1194_v24, %v1178_v22  ;;  %2807 = vmatmul.mubr.msk.f32.gmra.mrb[44].mxu1 %vm1227_vm2, %v3540_v13  ;;  %1500 = vmatprep.mubr.f32.mxu0 %v3145_v0  ;;  %v1026_v39 = vadd.f32 %v1025_v29, %v3479_v31 }
 0x146   : > { %1589 = vmatprep.mubr.f32.mxu1 %v3145_v0  ;;  %v1115_v40 = vadd.f32 %v1114_v32, %v3479_v31  ;;  %v1147_v49 = vmax.f32 %v1024_v35, 0.0  ;;  %v1149_v50 = vmax.f32 %v1113_v38, 0.0 }
 0x147   : > { %v1029_v41 = vpop.f32.mrb[26].mxu0  ;;  %v1118_v42 = vpop.f32.mrb[26].mxu1  ;;  %2872 = vmatprep.subr.bf16.mxu0 %v2871_v33  ;;  %2880 = vmatprep.subr.bf16.mxu1 %v2879_v34  ;;  %v1148_v53 = vmax.f32 %v1026_v39, 0.0 }
 0x148   : > { %v1030_v43 = vadd.f32 %v1029_v41, %v3481_v36  ;;  %v1119_v44 = vadd.f32 %v1118_v42, %v3481_v36  ;;  %2804 = vmatmul.mubr.msk.f32.gmra.mrb[46].mxu0 %vm1227_vm2, %v3554_v30  ;;  %v1031_v46 = vpop.f32.mrb[27].mxu0  ;;  %v1120_v47 = vpop.f32.mrb[27].mxu1  ;;  %2882 = vmatpush1.bf16.msra.mxu1 %v2881_v28  ;;  %v1150_v54 = vmax.f32 %v1115_v40, 0.0 }
 0x149   : > { %2808 = vmatmul.mubr.msk.f32.gmra.mrb[46].mxu1 %vm1227_vm2, %v3554_v30  ;;  %v1032_v48 = vadd.f32 %v1031_v46, %v3481_v36  ;;  %v1121_v31 = vadd.f32 %v1120_v47, %v3481_v36  ;;  %2874 = vmatpush1.bf16.msra.mxu0 %v2873_v27  ;;  %v3667_v28 = vpop.permute.xlu0 %1209 }
 0x14a   : > { %v1163_v51 = vmax.f32 %v1030_v43, 0.0  ;;  %v1165_v52 = vmax.f32 %v1119_v44, 0.0  ;;  %1660 = vmatprep.mubr.f32.mxu0 %v3145_v0  ;;  %1749 = vmatprep.mubr.f32.mxu1 %v3145_v0 }
 0x14b   : > { %v1164_v55 = vmax.f32 %v1032_v48, 0.0  ;;  %v1166_v56 = vmax.f32 %v1121_v31, 0.0  ;;  %v1035_v57 = vpop.f32.mrb[28].mxu0  ;;  %v1124_v58 = vpop.f32.mrb[28].mxu1 }
 0x14c   : > { %v2885_v59 = vpack.c.bf16 %v1163_v51, %v1147_v49  ;;  %v2893_v60 = vpack.c.bf16 %v1165_v52, %v1149_v50  ;;  %2809 = vmatmul.mubr.msk.f32.vlgmr.msra.gmra.mrb[48].mxu0 %vm1227_vm2, %v3512_v45  ;;  %v1037_v36 = vpop.f32.mrb[29].mxu0  ;;  %v1126_v61 = vpop.f32.mrb[29].mxu1  ;;  %v1036_v2 = vadd.f32 %v1035_v57, %v3483_v37  ;;  %v1125_v4 = vadd.f32 %v1124_v58, %v3483_v37 }
 0x14d   : > { %v2883_v63 = vpack.c.bf16 %v1164_v55, %v1148_v53  ;;  %v2891_v1 = vpack.c.bf16 %v1166_v56, %v1150_v54  ;;  %2813 = vmatmul.mubr.msk.f32.vlgmr.msra.gmra.mrb[48].mxu1 %vm1227_vm2, %v3512_v45  ;;  %1666 = vmatprep.mubr.f32.mxu0 %v3145_v0  ;;  %v1038_v5 = vadd.f32 %v1037_v36, %v3483_v37  ;;  %v3679_v58 = vpop.permute.xlu0 %1219 }
 0x14e   : > { %1755 = vmatprep.mubr.f32.mxu1 %v3145_v0  ;;  %v1127_v6 = vadd.f32 %v1126_v61, %v3483_v37  ;;  %v1179_v15 = vmax.f32 %v1036_v2, 0.0  ;;  %v1181_v16 = vmax.f32 %v1125_v4, 0.0 }
 0x14f   : > { %v1041_v7 = vpop.f32.mrb[30].mxu0  ;;  %v1130_v8 = vpop.f32.mrb[30].mxu1  ;;  %2884 = vmatprep.subr.bf16.mxu0 %v2883_v63  ;;  %2892 = vmatprep.subr.bf16.mxu1 %v2891_v1  ;;  %v1180_v19 = vmax.f32 %v1038_v5, 0.0 }
 0x150   : > { %v1042_v9 = vadd.f32 %v1041_v7, %v3493_v3  ;;  %v1131_v10 = vadd.f32 %v1130_v8, %v3493_v3  ;;  %2810 = vmatmul.mubr.msk.f32.gmra.mrb[50].mxu0 %vm1227_vm2, %v3524_v62  ;;  %v1043_v11 = vpop.f32.mrb[31].mxu0  ;;  %v1132_v12 = vpop.f32.mrb[31].mxu1  ;;  %2894 = vmatpush1.bf16.msra.mxu1 %v2893_v60  ;;  %v1182_v20 = vmax.f32 %v1127_v6, 0.0 }
 0x151   : > { %2814 = vmatmul.mubr.msk.f32.gmra.mrb[50].mxu1 %vm1227_vm2, %v3524_v62  ;;  %v1044_v14 = vadd.f32 %v1043_v11, %v3493_v3  ;;  %v1133_v37 = vadd.f32 %v1132_v12, %v3493_v3  ;;  %2886 = vmatpush1.bf16.msra.mxu0 %v2885_v59 }
 0x152   : > { %v1195_v17 = vmax.f32 %v1042_v9, 0.0  ;;  %v1197_v18 = vmax.f32 %v1131_v10, 0.0  ;;  %1672 = vmatprep.mubr.f32.mxu0 %v3145_v0  ;;  %1761 = vmatprep.mubr.f32.mxu1 %v3145_v0 }
 0x153   : > { %v1196_v21 = vmax.f32 %v1044_v14, 0.0  ;;  %v1198_v22 = vmax.f32 %v1133_v37, 0.0 }
 0x154   : > { %v2889_v23 = vpack.c.bf16 %v1195_v17, %v1179_v15  ;;  %v2897_v24 = vpack.c.bf16 %v1197_v18, %v1181_v16  ;;  %2811 = vmatmul.mubr.msk.f32.gmra.mrb[52].mxu0 %vm1227_vm2, %v3540_v13 }
 0x155   : > { %v2887_v25 = vpack.c.bf16 %v1196_v21, %v1180_v19  ;;  %v2895_v3 = vpack.c.bf16 %v1198_v22, %v1182_v20  ;;  %2815 = vmatmul.mubr.msk.f32.gmra.mrb[52].mxu1 %vm1227_vm2, %v3540_v13  ;;  %1678 = vmatprep.mubr.f32.mxu0 %v3145_v0 }
 0x156   : > { %1767 = vmatprep.mubr.f32.mxu1 %v3145_v0 }
 0x157   : > { %2888 = vmatprep.subr.bf16.mxu0 %v2887_v25  ;;  %2896 = vmatprep.subr.bf16.mxu1 %v2895_v3 }
 0x158   : > { %2812 = vmatmul.mubr.msk.f32.gmra.mrb[54].mxu0 %vm1227_vm2, %v3554_v30  ;;  %2898 = vmatpush1.bf16.msra.mxu1 %v2897_v24 }
 0x159   : > { %2816 = vmatmul.mubr.msk.f32.gmra.mrb[54].mxu1 %vm1227_vm2, %v3554_v30  ;;  %2890 = vmatpush1.bf16.msra.mxu0 %v2889_v23 }
 0x15a   : > { %1838 = vmatprep.mubr.f32.mxu0 %v3145_v0  ;;  %1927 = vmatprep.mubr.f32.mxu1 %v3145_v0 }
 0x15c   : > { %2817 = vmatmul.mubr.msk.f32.vlgmr.msra.gmra.mrb[56].mxu0 %vm1227_vm2, %v3512_v45 }
 0x15d   : > { %2821 = vmatmul.mubr.msk.f32.vlgmr.msra.gmra.mrb[56].mxu1 %vm1227_vm2, %v3512_v45  ;;  %1844 = vmatprep.mubr.f32.mxu0 %v3145_v0 }
 0x15e   : > { %1933 = vmatprep.mubr.f32.mxu1 %v3145_v0 }
 0x160   : > { %2818 = vmatmul.mubr.msk.f32.gmra.mrb[58].mxu0 %vm1227_vm2, %v3524_v62 }
 0x161   : > { %2822 = vmatmul.mubr.msk.f32.gmra.mrb[58].mxu1 %vm1227_vm2, %v3524_v62  ;;  %1850 = vmatprep.mubr.f32.mxu0 %v3145_v0 }
 0x162   : > { %1939 = vmatprep.mubr.f32.mxu1 %v3145_v0 }
 0x164   : > { %2819 = vmatmul.mubr.msk.f32.gmra.mrb[60].mxu0 %vm1227_vm2, %v3540_v13 }
 0x165   : > { %2823 = vmatmul.mubr.msk.f32.gmra.mrb[60].mxu1 %vm1227_vm2, %v3540_v13  ;;  %1856 = vmatprep.mubr.f32.mxu0 %v3145_v0  ;;  %v3669_v13 = vpop.permute.xlu1 %1214 }
 0x166   : > { %1945 = vmatprep.mubr.f32.mxu1 %v3145_v0 }
 0x168   : > { %2820 = vmatmul.mubr.msk.f32.gmra.mrb[62].mxu0 %vm1227_vm2, %v3554_v30 }
 0x169   : > { %2824 = vmatmul.mubr.msk.f32.gmra.mrb[62].mxu1 %vm1227_vm2, %v3554_v30  ;;  %2090 = vmatprep.mubr.f32.mxu0 %v3145_v0  ;;  %v3681_v36 = vpop.permute.xlu1 %1224 }
 0x16a   : > { %2161 = vmatprep.mubr.f32.mxu1 %v3145_v0 }
 0x1fe   : > { %v1306_v45 = vpop.f32.mrb[32].mxu0  ;;  %v1395_v62 = vpop.f32.mrb[32].mxu1 }
 0x1ff   : > { %v1308_v26 = vpop.f32.mrb[33].mxu0  ;;  %v1397_v27 = vpop.f32.mrb[33].mxu1  ;;  %v1307_v29 = vadd.f32 %v1306_v45, %v3667_v28  ;;  %v1396_v32 = vadd.f32 %v1395_v62, %v3667_v28 }
 0x200   : > { %v1309_v33 = vadd.f32 %v1308_v26, %v3667_v28  ;;  %v1398_v30 = vadd.f32 %v1397_v27, %v3667_v28 }
 0x201   : > { %v1952_v44 = vmax.f32 %v1307_v29, 0.0  ;;  %v1954_v46 = vmax.f32 %v1396_v32, 0.0  ;;  %v3697_v32 = vld [vmem:[%s3811_s5] sm:$0x7] }
 0x202   : > { %v1312_v34 = vpop.f32.mrb[34].mxu0  ;;  %v1401_v35 = vpop.f32.mrb[34].mxu1  ;;  %v1953_v31 = vmax.f32 %v1309_v33, 0.0  ;;  %v1955_v49 = vmax.f32 %v1398_v30, 0.0 }
 0x203   : > { %v1313_v38 = vadd.f32 %v1312_v34, %v3669_v13  ;;  %v1402_v39 = vadd.f32 %v1401_v35, %v3669_v13  ;;  %v1314_v40 = vpop.f32.mrb[35].mxu0  ;;  %v1403_v41 = vpop.f32.mrb[35].mxu1 }
 0x204   : > { %v1315_v42 = vadd.f32 %v1314_v40, %v3669_v13  ;;  %v1404_v43 = vadd.f32 %v1403_v41, %v3669_v13 }
 0x205   : > { %v1968_v47 = vmax.f32 %v1313_v38, 0.0  ;;  %v1970_v48 = vmax.f32 %v1402_v39, 0.0 }
 0x206   : > { %v1969_v50 = vmax.f32 %v1315_v42, 0.0  ;;  %v1971_v51 = vmax.f32 %v1404_v43, 0.0  ;;  %v1318_v52 = vpop.f32.mrb[36].mxu0  ;;  %v1407_v53 = vpop.f32.mrb[36].mxu1 }
 0x207   : > { %v2901_v54 = vpack.c.bf16 %v1968_v47, %v1952_v44  ;;  %v2909_v55 = vpack.c.bf16 %v1970_v48, %v1954_v46  ;;  %v1320_v56 = vpop.f32.mrb[37].mxu0  ;;  %v1409_v57 = vpop.f32.mrb[37].mxu1  ;;  %v1319_v61 = vadd.f32 %v1318_v52, %v3679_v58  ;;  %v1408_v63 = vadd.f32 %v1407_v53, %v3679_v58 }
 0x208   : > { %v2899_v59 = vpack.c.bf16 %v1969_v50, %v1953_v31  ;;  %v2907_v60 = vpack.c.bf16 %v1971_v51, %v1955_v49  ;;  %v1321_v1 = vadd.f32 %v1320_v56, %v3679_v58  ;;  %v1410_v2 = vadd.f32 %v1409_v57, %v3679_v58 }
 0x209   : > { %v1984_v12 = vmax.f32 %v1319_v61, 0.0  ;;  %v1986_v14 = vmax.f32 %v1408_v63, 0.0 }
 0x20a   : > { %v1324_v4 = vpop.f32.mrb[38].mxu0  ;;  %v1413_v5 = vpop.f32.mrb[38].mxu1  ;;  %2900 = vmatprep.subr.bf16.mxu0 %v2899_v59  ;;  %2908 = vmatprep.subr.bf16.mxu1 %v2907_v60  ;;  %v1985_v16 = vmax.f32 %v1321_v1, 0.0  ;;  %v1987_v17 = vmax.f32 %v1410_v2, 0.0 }
 0x20b   : > { %v1325_v6 = vadd.f32 %v1324_v4, %v3681_v36  ;;  %v1414_v7 = vadd.f32 %v1413_v5, %v3681_v36  ;;  %v1326_v8 = vpop.f32.mrb[39].mxu0  ;;  %v1415_v9 = vpop.f32.mrb[39].mxu1  ;;  %2902 = vmatpush1.bf16.msra.mxu0 %v2901_v54  ;;  %2910 = vmatpush1.bf16.msra.mxu1 %v2909_v55 }
 0x20c   : > { %v1327_v10 = vadd.f32 %v1326_v8, %v3681_v36  ;;  %v1416_v11 = vadd.f32 %v1415_v9, %v3681_v36 }
 0x20d   : > { %v2000_v37 = vmax.f32 %v1325_v6, 0.0  ;;  %v2002_v15 = vmax.f32 %v1414_v7, 0.0 }
 0x20e   : > { %v2001_v18 = vmax.f32 %v1327_v10, 0.0  ;;  %v2003_v19 = vmax.f32 %v1416_v11, 0.0 }
 0x20f   : > { %v2905_v20 = vpack.c.bf16 %v2000_v37, %v1984_v12  ;;  %v2913_v21 = vpack.c.bf16 %v2002_v15, %v1986_v14  ;;  %v1484_v22 = vpop.f32.mrb[40].mxu0  ;;  %v1573_v25 = vpop.f32.mrb[40].mxu1 }
 0x210   : > { %v2903_v23 = vpack.c.bf16 %v2001_v18, %v1985_v16  ;;  %v2911_v24 = vpack.c.bf16 %v2003_v19, %v1987_v17  ;;  %v1486_v3 = vpop.f32.mrb[41].mxu0  ;;  %v1575_v45 = vpop.f32.mrb[41].mxu1  ;;  %v1485_v62 = vadd.f32 %v1484_v22, %v3667_v28  ;;  %v1574_v26 = vadd.f32 %v1573_v25, %v3667_v28 }
 0x211   : > { %v1487_v27 = vadd.f32 %v1486_v3, %v3667_v28  ;;  %v1576_v33 = vadd.f32 %v1575_v45, %v3667_v28 }
 0x212   : > { %2904 = vmatprep.subr.bf16.mxu0 %v2903_v23  ;;  %2912 = vmatprep.subr.bf16.mxu1 %v2911_v24  ;;  %v1956_v41 = vmax.f32 %v1485_v62, 0.0  ;;  %v1958_v44 = vmax.f32 %v1574_v26, 0.0 }
 0x213   : > { %v1490_v29 = vpop.f32.mrb[42].mxu0  ;;  %2906 = vmatpush1.bf16.msra.mxu0 %v2905_v20  ;;  %2914 = vmatpush1.bf16.msra.mxu1 %v2913_v21  ;;  %v1957_v46 = vmax.f32 %v1487_v27, 0.0  ;;  %v1959_v49 = vmax.f32 %v1576_v33, 0.0 }
 0x214   : > { %v1491_v30 = vadd.f32 %v1490_v29, %v3669_v13  ;;  %v1579_v34 = vpop.f32.mrb[42].mxu1  ;;  %v1492_v35 = vpop.f32.mrb[43].mxu0 }
 0x215   : > { %v1580_v38 = vadd.f32 %v1579_v34, %v3669_v13  ;;  %v1493_v39 = vadd.f32 %v1492_v35, %v3669_v13  ;;  %v1581_v40 = vpop.f32.mrb[43].mxu1 }
 0x216   : > { %v1972_v42 = vmax.f32 %v1491_v30, 0.0  ;;  %v1582_v43 = vadd.f32 %v1581_v40, %v3669_v13  ;;  %2825 = vmatmul.mubr.msk.f32.vlgmr.msra.gmra.mrb[64].mxu0 %vm1227_vm2, %v3697_v32  ;;  %2826 = vmatmul.mubr.msk.f32.vlgmr.msra.gmra.mrb[64].mxu1 %vm1227_vm2, %v3697_v32 }
 0x217   : > { %v1974_v47 = vmax.f32 %v1580_v38, 0.0  ;;  %v1973_v48 = vmax.f32 %v1493_v39, 0.0  ;;  %v1496_v31 = vpop.f32.mrb[44].mxu0  ;;  %2232 = vmatprep.mubr.f32.mxu0 %v3145_v0  ;;  %2303 = vmatprep.mubr.f32.mxu1 %v3145_v0 }
 0x218   : > { %v2917_v50 = vpack.c.bf16 %v1972_v42, %v1956_v41  ;;  %v1975_v51 = vmax.f32 %v1582_v43, 0.0  ;;  %v1585_v52 = vpop.f32.mrb[44].mxu1  ;;  %v1498_v53 = vpop.f32.mrb[45].mxu0  ;;  %v1497_v59 = vadd.f32 %v1496_v31, %v3679_v58 }
 0x219   : > { %v2925_v54 = vpack.c.bf16 %v1974_v47, %v1958_v44  ;;  %v2915_v55 = vpack.c.bf16 %v1973_v48, %v1957_v46  ;;  %v1587_v56 = vpop.f32.mrb[45].mxu1  ;;  %v1586_v60 = vadd.f32 %v1585_v52, %v3679_v58  ;;  %v1499_v61 = vadd.f32 %v1498_v53, %v3679_v58 }
 0x21a   : > { %v2923_v57 = vpack.c.bf16 %v1975_v51, %v1959_v49  ;;  %v1588_v1 = vadd.f32 %v1587_v56, %v3679_v58  ;;  %v1988_v9 = vmax.f32 %v1497_v59, 0.0 }
 0x21b   : > { %v1502_v63 = vpop.f32.mrb[46].mxu0  ;;  %2916 = vmatprep.subr.bf16.mxu0 %v2915_v55  ;;  %v1990_v12 = vmax.f32 %v1586_v60, 0.0  ;;  %v1989_v14 = vmax.f32 %v1499_v61, 0.0 }
 0x21c   : > { %v1503_v2 = vadd.f32 %v1502_v63, %v3681_v36  ;;  %v1591_v4 = vpop.f32.mrb[46].mxu1  ;;  %2924 = vmatprep.subr.bf16.mxu1 %v2923_v57  ;;  %v1504_v5 = vpop.f32.mrb[47].mxu0  ;;  %2918 = vmatpush1.bf16.msra.mxu0 %v2917_v50  ;;  %v1991_v17 = vmax.f32 %v1588_v1, 0.0 }
 0x21d   : > { %v1592_v6 = vadd.f32 %v1591_v4, %v3681_v36  ;;  %v1505_v7 = vadd.f32 %v1504_v5, %v3681_v36  ;;  %v1593_v8 = vpop.f32.mrb[47].mxu1  ;;  %2926 = vmatpush1.bf16.msra.mxu1 %v2925_v54 }
 0x21e   : > { %v2004_v10 = vmax.f32 %v1503_v2, 0.0  ;;  %v1594_v11 = vadd.f32 %v1593_v8, %v3681_v36 }
 0x21f   : > { %v2006_v37 = vmax.f32 %v1592_v6, 0.0  ;;  %v2005_v15 = vmax.f32 %v1505_v7, 0.0  ;;  %v1662_v16 = vpop.f32.mrb[48].mxu0 }
 0x220   : > { %v2921_v18 = vpack.c.bf16 %v2004_v10, %v1988_v9  ;;  %v2007_v19 = vmax.f32 %v1594_v11, 0.0  ;;  %v1751_v20 = vpop.f32.mrb[48].mxu1  ;;  %v1664_v21 = vpop.f32.mrb[49].mxu0  ;;  %v1663_v3 = vadd.f32 %v1662_v16, %v3667_v28 }
 0x221   : > { %v2929_v22 = vpack.c.bf16 %v2006_v37, %v1990_v12  ;;  %v2919_v23 = vpack.c.bf16 %v2005_v15, %v1989_v14  ;;  %v1753_v24 = vpop.f32.mrb[49].mxu1  ;;  %v1752_v45 = vadd.f32 %v1751_v20, %v3667_v28  ;;  %v1665_v62 = vadd.f32 %v1664_v21, %v3667_v28 }
 0x222   : > { %v2927_v25 = vpack.c.bf16 %v2007_v19, %v1991_v17  ;;  %v1754_v27 = vadd.f32 %v1753_v24, %v3667_v28  ;;  %v1960_v39 = vmax.f32 %v1663_v3, 0.0 }
 0x223   : > { %v1668_v26 = vpop.f32.mrb[50].mxu0  ;;  %2920 = vmatprep.subr.bf16.mxu0 %v2919_v23  ;;  %v1962_v42 = vmax.f32 %v1752_v45, 0.0  ;;  %v1961_v43 = vmax.f32 %v1665_v62, 0.0 }
 0x224   : > { %v1669_v29 = vadd.f32 %v1668_v26, %v3669_v13  ;;  %v1757_v33 = vpop.f32.mrb[50].mxu1  ;;  %2928 = vmatprep.subr.bf16.mxu1 %v2927_v25  ;;  %v1670_v30 = vpop.f32.mrb[51].mxu0  ;;  %2922 = vmatpush1.bf16.msra.mxu0 %v2921_v18  ;;  %v1963_v48 = vmax.f32 %v1754_v27, 0.0 }
 0x225   : > { %v1758_v34 = vadd.f32 %v1757_v33, %v3669_v13  ;;  %v1671_v35 = vadd.f32 %v1670_v30, %v3669_v13  ;;  %v1759_v38 = vpop.f32.mrb[51].mxu1  ;;  %2930 = vmatpush1.bf16.msra.mxu1 %v2929_v22 }
 0x226   : > { %v1976_v40 = vmax.f32 %v1669_v29, 0.0  ;;  %v1760_v41 = vadd.f32 %v1759_v38, %v3669_v13 }
 0x227   : > { %v1978_v44 = vmax.f32 %v1758_v34, 0.0  ;;  %v1977_v46 = vmax.f32 %v1671_v35, 0.0  ;;  %v1674_v47 = vpop.f32.mrb[52].mxu0  ;;  %2827 = vmatmul.mubr.msk.f32.vlgmr.msra.gmra.mrb[66].mxu0 %vm1227_vm2, %v3697_v32 }
 0x228   : > { %v2933_v31 = vpack.c.bf16 %v1976_v40, %v1960_v39  ;;  %v1979_v49 = vmax.f32 %v1760_v41, 0.0  ;;  %v1763_v50 = vpop.f32.mrb[52].mxu1  ;;  %2828 = vmatmul.mubr.msk.f32.vlgmr.msra.gmra.mrb[66].mxu1 %vm1227_vm2, %v3697_v32  ;;  %v1676_v51 = vpop.f32.mrb[53].mxu0  ;;  %2374 = vmatprep.mubr.f32.mxu0 %v3145_v0  ;;  %v1675_v56 = vadd.f32 %v1674_v47, %v3679_v58 }
 0x229   : > { %v2941_v52 = vpack.c.bf16 %v1978_v44, %v1962_v42  ;;  %v2931_v53 = vpack.c.bf16 %v1977_v46, %v1961_v43  ;;  %v1765_v54 = vpop.f32.mrb[53].mxu1  ;;  %2445 = vmatprep.mubr.f32.mxu1 %v3145_v0  ;;  %v1764_v57 = vadd.f32 %v1763_v50, %v3679_v58  ;;  %v1677_v59 = vadd.f32 %v1676_v51, %v3679_v58 }
 0x22a   : > { %v2939_v55 = vpack.c.bf16 %v1979_v49, %v1963_v48  ;;  %v1766_v61 = vadd.f32 %v1765_v54, %v3679_v58  ;;  %v1992_v7 = vmax.f32 %v1675_v56, 0.0 }
 0x22b   : > { %v1680_v60 = vpop.f32.mrb[54].mxu0  ;;  %2932 = vmatprep.subr.bf16.mxu0 %v2931_v53  ;;  %v1994_v10 = vmax.f32 %v1764_v57, 0.0  ;;  %v1993_v11 = vmax.f32 %v1677_v59, 0.0 }
 0x22c   : > { %v1681_v63 = vadd.f32 %v1680_v60, %v3681_v36  ;;  %v1769_v1 = vpop.f32.mrb[54].mxu1  ;;  %2940 = vmatprep.subr.bf16.mxu1 %v2939_v55  ;;  %v1682_v2 = vpop.f32.mrb[55].mxu0  ;;  %2934 = vmatpush1.bf16.msra.mxu0 %v2933_v31  ;;  %v1995_v15 = vmax.f32 %v1766_v61, 0.0 }
 0x22d   : > { %v1770_v4 = vadd.f32 %v1769_v1, %v3681_v36  ;;  %v1683_v5 = vadd.f32 %v1682_v2, %v3681_v36  ;;  %v1771_v6 = vpop.f32.mrb[55].mxu1  ;;  %2942 = vmatpush1.bf16.msra.mxu1 %v2941_v52 }
 0x22e   : > { %v2008_v8 = vmax.f32 %v1681_v63, 0.0  ;;  %v1772_v9 = vadd.f32 %v1771_v6, %v3681_v36 }
 0x22f   : > { %v2010_v12 = vmax.f32 %v1770_v4, 0.0  ;;  %v2009_v14 = vmax.f32 %v1683_v5, 0.0  ;;  %v1840_v37 = vpop.f32.mrb[56].mxu0 }
 0x230   : > { %v2937_v16 = vpack.c.bf16 %v2008_v8, %v1992_v7  ;;  %v2011_v17 = vmax.f32 %v1772_v9, 0.0  ;;  %v1929_v18 = vpop.f32.mrb[56].mxu1  ;;  %v1842_v19 = vpop.f32.mrb[57].mxu0  ;;  %v1841_v24 = vadd.f32 %v1840_v37, %v3667_v28 }
 0x231   : > { %v2945_v20 = vpack.c.bf16 %v2010_v12, %v1994_v10  ;;  %v2935_v21 = vpack.c.bf16 %v2009_v14, %v1993_v11  ;;  %v1931_v22 = vpop.f32.mrb[57].mxu1  ;;  %v1930_v25 = vadd.f32 %v1929_v18, %v3667_v28  ;;  %v1843_v3 = vadd.f32 %v1842_v19, %v3667_v28 }
 0x232   : > { %v2943_v23 = vpack.c.bf16 %v2011_v17, %v1995_v15  ;;  %v1932_v62 = vadd.f32 %v1931_v22, %v3667_v28  ;;  %v1964_v35 = vmax.f32 %v1841_v24, 0.0 }
 0x233   : > { %v1846_v45 = vpop.f32.mrb[58].mxu0  ;;  %2936 = vmatprep.subr.bf16.mxu0 %v2935_v21  ;;  %v1966_v40 = vmax.f32 %v1930_v25, 0.0  ;;  %v1965_v41 = vmax.f32 %v1843_v3, 0.0 }
 0x234   : > { %v1847_v26 = vadd.f32 %v1846_v45, %v3669_v13  ;;  %v1935_v27 = vpop.f32.mrb[58].mxu1  ;;  %2944 = vmatprep.subr.bf16.mxu1 %v2943_v23  ;;  %v1848_v29 = vpop.f32.mrb[59].mxu0  ;;  %2938 = vmatpush1.bf16.msra.mxu0 %v2937_v16  ;;  %v1967_v44 = vmax.f32 %v1932_v62, 0.0 }
 0x235   : > { %v1936_v33 = vadd.f32 %v1935_v27, %v3669_v13  ;;  %v1849_v30 = vadd.f32 %v1848_v29, %v3669_v13  ;;  %v1937_v34 = vpop.f32.mrb[59].mxu1  ;;  %2946 = vmatpush1.bf16.msra.mxu1 %v2945_v20 }
 0x236   : > { %v1980_v38 = vmax.f32 %v1847_v26, 0.0  ;;  %v1938_v39 = vadd.f32 %v1937_v34, %v3669_v13 }
 0x237   : > { %v1982_v42 = vmax.f32 %v1936_v33, 0.0  ;;  %v1981_v28 = vmax.f32 %v1849_v30, 0.0  ;;  %v1852_v43 = vpop.f32.mrb[60].mxu0  ;;  %2829 = vmatmul.mubr.msk.f32.vlgmr.msra.gmra.mrb[68].mxu0 %vm1227_vm2, %v3697_v32 }
 0x238   : > { %v2949_v46 = vpack.c.bf16 %v1980_v38, %v1964_v35  ;;  %v1983_v47 = vmax.f32 %v1938_v39, 0.0  ;;  %v1941_v48 = vpop.f32.mrb[60].mxu1  ;;  %2830 = vmatmul.mubr.msk.f32.vlgmr.msra.gmra.mrb[68].mxu1 %vm1227_vm2, %v3697_v32  ;;  %v1854_v31 = vpop.f32.mrb[61].mxu0  ;;  %2516 = vmatprep.mubr.f32.mxu0 %v3145_v0  ;;  %v1853_v52 = vadd.f32 %v1852_v43, %v3679_v58 }
 0x239   : > { %v2957_v49 = vpack.c.bf16 %v1982_v42, %v1966_v40  ;;  %v2947_v13 = vpack.c.bf16 %v1981_v28, %v1965_v41  ;;  %v1943_v50 = vpop.f32.mrb[61].mxu1  ;;  %2587 = vmatprep.mubr.f32.mxu1 %v3145_v0  ;;  %v1942_v53 = vadd.f32 %v1941_v48, %v3679_v58  ;;  %v1855_v54 = vadd.f32 %v1854_v31, %v3679_v58 }
 0x23a   : > { %v2955_v51 = vpack.c.bf16 %v1983_v47, %v1967_v44  ;;  %v1944_v56 = vadd.f32 %v1943_v50, %v3679_v58  ;;  %v1996_v1 = vmax.f32 %v1853_v52, 0.0 }
 0x23b   : > { %v1858_v55 = vpop.f32.mrb[62].mxu0  ;;  %2948 = vmatprep.subr.bf16.mxu0 %v2947_v13  ;;  %v1998_v5 = vmax.f32 %v1942_v53, 0.0  ;;  %v1997_v6 = vmax.f32 %v1855_v54, 0.0 }
 0x23c   : > { %v1859_v57 = vadd.f32 %v1858_v55, %v3681_v36  ;;  %v1947_v59 = vpop.f32.mrb[62].mxu1  ;;  %2956 = vmatprep.subr.bf16.mxu1 %v2955_v51  ;;  %v1860_v60 = vpop.f32.mrb[63].mxu0  ;;  %2950 = vmatpush1.bf16.msra.mxu0 %v2949_v46  ;;  %v1999_v8 = vmax.f32 %v1944_v56, 0.0 }
 0x23d   : > { %v1948_v61 = vadd.f32 %v1947_v59, %v3681_v36  ;;  %v1861_v0 = vadd.f32 %v1860_v60, %v3681_v36  ;;  %v1949_v63 = vpop.f32.mrb[63].mxu1  ;;  %2958 = vmatpush1.bf16.msra.mxu1 %v2957_v49 }
 0x23e   : > { %v2012_v2 = vmax.f32 %v1859_v57, 0.0  ;;  %v1950_v4 = vadd.f32 %v1949_v63, %v3681_v36  ;;  %v2021_v36 = vpop.permute.xlu0 %2020 }
 0x23f   : > { %v2014_v58 = vmax.f32 %v1948_v61, 0.0  ;;  %v2013_v7 = vmax.f32 %v1861_v0, 0.0 }
 0x240   : > { %v2953_v9 = vpack.c.bf16 %v2012_v2, %v1996_v1  ;;  %v2015_v10 = vmax.f32 %v1950_v4, 0.0 }
 0x241   : > { %v2961_v11 = vpack.c.bf16 %v2014_v58, %v1998_v5  ;;  %v2951_v12 = vpack.c.bf16 %v2013_v7, %v1997_v6 }
 0x242   : > { %v2959_v14 = vpack.c.bf16 %v2015_v10, %v1999_v8 }
 0x243   : > { %2952 = vmatprep.subr.bf16.mxu0 %v2951_v12 }
 0x244   : > { %2960 = vmatprep.subr.bf16.mxu1 %v2959_v14  ;;  %2954 = vmatpush1.bf16.msra.mxu0 %v2953_v9 }
 0x245   : > { %2962 = vmatpush1.bf16.msra.mxu1 %v2961_v11 }
 0x247   : > { %2831 = vmatmul.mubr.msk.f32.vlgmr.msra.gmra.mrb[70].mxu0 %vm1227_vm2, %v3697_v32 }
 0x248   : > { %2832 = vmatmul.mubr.msk.f32.vlgmr.msra.gmra.mrb[70].mxu1 %vm1227_vm2, %v3697_v32 }
 0x2e9   : > { %v2092_v37 = vpop.f32.mrb[64].mxu0  ;;  %v2163_v15 = vpop.f32.mrb[64].mxu1 }
 0x2ea   : > { %v2093_v16 = vadd.f32 %v2092_v37, %v2021_v36  ;;  %v2164_v17 = vadd.f32 %v2163_v15, %v2021_v36  ;;  %v2094_v18 = vpop.f32.mrb[65].mxu0  ;;  %v2165_v19 = vpop.f32.mrb[65].mxu1 }
 0x2eb   : > { %v2095_v20 = vadd.f32 %v2094_v18, %v2021_v36  ;;  %v2166_v21 = vadd.f32 %v2165_v19, %v2021_v36 }
 0x2ed   : > { %v2610_v32 = vcombine.low %v2093_v16, %v2095_v20  ;;  %v2611_v22 = vcombine.low %v2164_v17, %v2166_v21 }
 0x2ef   : > { %2626 = vst [vmem:[%s3772_s27] sm:$0x77] %v2610_v32  ;;  %2627 = vst [vmem:[%s3772_s27 + $0x8] sm:$0x77] %v2611_v22 }
 0x2fa   : > { %v2234_v23 = vpop.f32.mrb[66].mxu0 }
 0x2fb   : > { %v2235_v24 = vadd.f32 %v2234_v23, %v2021_v36  ;;  %v2305_v25 = vpop.f32.mrb[66].mxu1  ;;  %v2236_v3 = vpop.f32.mrb[67].mxu0 }
 0x2fc   : > { %v2306_v45 = vadd.f32 %v2305_v25, %v2021_v36  ;;  %v2237_v62 = vadd.f32 %v2236_v3, %v2021_v36  ;;  %v2307_v26 = vpop.f32.mrb[67].mxu1 }
 0x2fd   : > { %v2308_v27 = vadd.f32 %v2307_v26, %v2021_v36 }
 0x2fe   : > { %v2612_v29 = vcombine.low %v2235_v24, %v2237_v62 }
 0x2ff   : > { %v2613_v33 = vcombine.low %v2306_v45, %v2308_v27 }
 0x300   : > { %2628 = vst [vmem:[%s3772_s27 + $0x10] sm:$0x77] %v2612_v29 }
 0x301   : > { %2629 = vst [vmem:[%s3772_s27 + $0x18] sm:$0x77] %v2613_v33 }
 0x30a   : > { %v2376_v30 = vpop.f32.mrb[68].mxu0 }
 0x30b   : > { %v2377_v34 = vadd.f32 %v2376_v30, %v2021_v36  ;;  %v2447_v35 = vpop.f32.mrb[68].mxu1  ;;  %v2378_v38 = vpop.f32.mrb[69].mxu0 }
 0x30c   : > { %v2448_v39 = vadd.f32 %v2447_v35, %v2021_v36  ;;  %v2379_v40 = vadd.f32 %v2378_v38, %v2021_v36  ;;  %v2449_v41 = vpop.f32.mrb[69].mxu1 }
 0x30d   : > { %v2450_v42 = vadd.f32 %v2449_v41, %v2021_v36 }
 0x30e   : > { %v2614_v28 = vcombine.low %v2377_v34, %v2379_v40 }
 0x30f   : > { %v2615_v43 = vcombine.low %v2448_v39, %v2450_v42 }
 0x310   : > { %2630 = vst [vmem:[%s3772_s27 + $0x20] sm:$0x77] %v2614_v28 }
 0x311   : > { %2631 = vst [vmem:[%s3772_s27 + $0x28] sm:$0x77] %v2615_v43 }
 0x31a   : > { %v2518_v44 = vpop.f32.mrb[70].mxu0 }
 0x31b   : > { %v2519_v46 = vadd.f32 %v2518_v44, %v2021_v36  ;;  %v2589_v47 = vpop.f32.mrb[70].mxu1  ;;  %v2520_v48 = vpop.f32.mrb[71].mxu0 }
 0x31c   : > { %v2590_v31 = vadd.f32 %v2589_v47, %v2021_v36  ;;  %v2521_v49 = vadd.f32 %v2520_v48, %v2021_v36  ;;  %v2591_v13 = vpop.f32.mrb[71].mxu1 }
 0x31d   : > { %v2592_v50 = vadd.f32 %v2591_v13, %v2021_v36 }
 0x31e   : > { %v2616_v51 = vcombine.low %v2519_v46, %v2521_v49 }
 0x31f   : > { %v2617_v52 = vcombine.low %v2590_v31, %v2592_v50 }
 0x320   : > { %2632 = vst [vmem:[%s3772_s27 + $0x30] sm:$0x77] %v2616_v51 }
 0x321   : > { %2633 = vst [vmem:[%s3772_s27 + $0x38] sm:$0x77] %v2617_v52 }
 0x322 PF: > { %s20_s8 = sadd.s32 1, %s3142_s8   ;;  %s3828_s19 = sld [smem:[#allocation6_spill]] }
 0x323   : > { %p17_p11 = scmp.ge.s32.totalorder %s20_s8, 6   ;;  %s3829_s20 = sld [smem:[#allocation7_spill]] }
 0x324   : > { %s3830_s24 = smov %s3118_s25  ;;  %s3831_s25 = smov %s3122_s26 }
 0x325   : > { %s3832_s26 = smov %s3254_s21  ;;  %s3833_s27 = smov %s3134_s29 }
 0x326   : > { %s3834_s28 = smov %s3138_s30  ;;  %19 = sbr.rel (!%p17_p11) target bundleno = 7 (0x7), region = 88 }
 0x328   : > { %s3835_s29 = smov %s3828_s19 }
 0x329   : > { %s3836_s30 = smov %s3829_s20 }
 0x32d   :  { %2664 = vsyncpa [#allocation3], 1 }
 0x32e   :  { %2666 = vsyncpa [#allocation3 + $0x1], 1 }

</bundles_post_ra>
